<compile_context>
chip_gen: v6e
topology: v6e:2x2x1
jax: 0.10.0
libtpu: 0.0.40
codegen_flags: <defaults>
</compile_context>

<pallas_src>
import functools

import jax
import jax.numpy as jnp
from jax.experimental import pallas as pl
from jax.experimental.pallas import tpu as pltpu


def identity(x, *args, **kwargs):
    return x


def _round_up(n, m):
    return (n + m - 1) // m * m


def _project_in_out_kernel(x_ref, w_in_ref, b_in_ref, w_out_ref, b_out_ref, o_ref, *, fn):
    # x_ref:    (bp, dim_in)
    # w_in_ref: (dim_in, dim_out)   (pre-transposed in the wrapper)
    # b_in_ref: (1, dim_out)
    # w_out_ref:(dim_out, dim_in)   (pre-transposed in the wrapper)
    # b_out_ref:(1, dim_in)
    # o_ref:    (bp, dim_in)
    x = x_ref[...]
    h = jnp.dot(x, w_in_ref[...], preferred_element_type=jnp.float32)
    h = h + b_in_ref[...].astype(jnp.float32)
    h = fn(h)
    h = h.astype(w_out_ref.dtype)
    y = jnp.dot(h, w_out_ref[...], preferred_element_type=jnp.float32)
    y = y + b_out_ref[...].astype(jnp.float32)
    o_ref[...] = y.astype(o_ref.dtype)          # single full-tile store per grid step


def _project_in_kernel(x_ref, w_in_ref, b_in_ref, o_ref, *, fn):
    # project_out=False path: only the in-projection (+ fn).
    x = x_ref[...]
    h = jnp.dot(x, w_in_ref[...], preferred_element_type=jnp.float32)
    h = h + b_in_ref[...].astype(jnp.float32)
    h = fn(h)
    o_ref[...] = h.astype(o_ref.dtype)


def project_in_out(x, w_in, b_in, w_out=None, b_out=None, *,
                   fn=identity, project_out=True, block_rows=256):
    """ProjectInOut.forward.

    x:     (..., dim_in)
    w_in:  (dim_out, dim_in), b_in: (dim_out,)   -- PyTorch nn.Linear layout
    w_out: (dim_in, dim_out), b_out: (dim_in,)
    """
    *lead, dim_in = x.shape
    dim_out = w_in.shape[0]
    rows = 1
    for s in lead:
        rows *= s

    xm = x.reshape(rows, dim_in)

    # Row blocking: one grid step handles `bp` rows (>= 8-sublane aligned); pad and
    # slice back so arbitrary leading shapes are supported.
    bp = min(block_rows, _round_up(rows, 8))
    rows_p = _round_up(rows, bp)
    if rows_p != rows:
        xm = jnp.pad(xm, ((0, rows_p - rows), (0, 0)))

    # Pre-transpose weights once on the wrapper side (no in-kernel XLU transposes);
    # keep operands in their native dtype (no f32 shadow copies in VMEM).
    w_in_t = jnp.transpose(w_in)                 # (dim_in, dim_out)
    b_in_2d = b_in.reshape(1, dim_out)

    grid = (rows_p // bp,)
    x_spec = pl.BlockSpec((bp, dim_in), lambda i: (i, 0))
    w_in_spec = pl.BlockSpec((dim_in, dim_out), lambda i: (0, 0))
    b_in_spec = pl.BlockSpec((1, dim_out), lambda i: (0, 0))

    if project_out:
        w_out_t = jnp.transpose(w_out)           # (dim_out, dim_in)
        b_out_2d = b_out.reshape(1, dim_in)
        out_dim = dim_in
        kern = functools.partial(_project_in_out_kernel, fn=fn)
        in_specs = [x_spec, w_in_spec, b_in_spec,
                    pl.BlockSpec((dim_out, dim_in), lambda i: (0, 0)),
                    pl.BlockSpec((1, dim_in), lambda i: (0, 0))]
        args = (xm, w_in_t, b_in_2d, w_out_t, b_out_2d)
    else:
        out_dim = dim_out
        kern = functools.partial(_project_in_kernel, fn=fn)
        in_specs = [x_spec, w_in_spec, b_in_spec]
        args = (xm, w_in_t, b_in_2d)

    out = pl.pallas_call(
        kern,
        out_shape=jax.ShapeDtypeStruct((rows_p, out_dim), x.dtype),
        grid_spec=pltpu.PrefetchScalarGridSpec(
            num_scalar_prefetch=0,
            grid=grid,
            in_specs=in_specs,
            out_specs=pl.BlockSpec((bp, out_dim), lambda i: (i, 0)),
        ),
        compiler_params=pltpu.CompilerParams(
            dimension_semantics=("parallel",),
            vmem_limit_bytes=64 * 1024 * 1024,
        ),
    )(*args)

    if rows_p != rows:
        out = out[:rows]
    return out.reshape(*lead, out_dim)


def _reference(x, w_in, b_in, w_out=None, b_out=None, fn=identity, project_out=True):
    """Pure-JAX reproduction of ProjectInOut.forward for checking."""
    h = jnp.einsum('...i,oi->...o', x, w_in) + b_in
    h = fn(h)
    if not project_out:
        return h
    return jnp.einsum('...o,io->...i', h, w_out) + b_out


if __name__ == "__main__":
    key = jax.random.PRNGKey(0)
    batch, seq, dim_in, dim_out = 2, 16, 32, 64

    kx, k1, k2, k3, k4 = jax.random.split(key, 5)
    x = jax.random.normal(kx, (batch, seq, dim_in), jnp.float32)
    w_in = jax.random.normal(k1, (dim_out, dim_in), jnp.float32) * (dim_in ** -0.5)
    b_in = jax.random.normal(k2, (dim_out,), jnp.float32)
    w_out = jax.random.normal(k3, (dim_in, dim_out), jnp.float32) * (dim_out ** -0.5)
    b_out = jax.random.normal(k4, (dim_in,), jnp.float32)

    # Full forward (project_out=True, fn=identity — the module defaults).
    out = project_in_out(x, w_in, b_in, w_out, b_out)
    out = jax.block_until_ready(out)
    ref = _reference(x, w_in, b_in, w_out, b_out)
    assert out.shape == (batch, seq, dim_in)
    assert jnp.allclose(out, ref, atol=1e-4, rtol=1e-4), "mismatch vs reference (project_out=True)"

    # Multi-step grid + row padding path.
    out_small = project_in_out(x, w_in, b_in, w_out, b_out, block_rows=8)
    out_small = jax.block_until_ready(out_small)
    assert jnp.allclose(out_small, ref, atol=1e-4, rtol=1e-4), "mismatch vs reference (blocked grid)"

    # project_out=False path (project_out becomes identity in the module).
    out_noproj = project_in_out(x, w_in, b_in, project_out=False)
    out_noproj = jax.block_until_ready(out_noproj)
    ref_noproj = _reference(x, w_in, b_in, project_out=False)
    assert out_noproj.shape == (batch, seq, dim_out)
    assert jnp.allclose(out_noproj, ref_noproj, atol=1e-4, rtol=1e-4), "mismatch vs reference (project_out=False)"

    print("KERNEL_OK")
</pallas_src>

<mosaic_0001>
module attributes {stable_mosaic.version = 11 : i64} {
  func.func @_project_in_out_kernel(%arg0: i32, %arg1: memref<32x32xf32, #tpu.memory_space<vmem>>, %arg2: memref<32x64xf32, #tpu.memory_space<vmem>>, %arg3: memref<1x64xf32, #tpu.memory_space<vmem>>, %arg4: memref<64x32xf32, #tpu.memory_space<vmem>>, %arg5: memref<1x32xf32, #tpu.memory_space<vmem>>, %arg6: memref<32x32xf32, #tpu.memory_space<vmem>>) attributes {dimension_semantics = [#tpu.dimension_semantics<parallel>], iteration_bounds = array<i64: 1>, scalar_prefetch = 0 : i64, scratch_operands = 0 : i64, tpu.core_type = #tpu.core_type<tc>, window_params = [{transform_indices = @transform_0, window_bounds = array<i64: 32, 32>}, {pipeline_mode = #tpu.pipeline_mode<synchronous>, transform_indices = @transform_1, window_bounds = array<i64: 32, 64>}, {pipeline_mode = #tpu.pipeline_mode<synchronous>, transform_indices = @transform_2, window_bounds = array<i64: 1, 64>}, {pipeline_mode = #tpu.pipeline_mode<synchronous>, transform_indices = @transform_3, window_bounds = array<i64: 64, 32>}, {pipeline_mode = #tpu.pipeline_mode<synchronous>, transform_indices = @transform_4, window_bounds = array<i64: 1, 32>}, {transform_indices = @transform_5, window_bounds = array<i64: 32, 32>}]} {
    %c0 = arith.constant 0 : index
    %c0_0 = arith.constant 0 : index
    %0 = vector.load %arg1[%c0, %c0_0] : memref<32x32xf32, #tpu.memory_space<vmem>>, vector<32x32xf32>
    %c0_1 = arith.constant 0 : index
    %c0_2 = arith.constant 0 : index
    %1 = vector.load %arg2[%c0_1, %c0_2] : memref<32x64xf32, #tpu.memory_space<vmem>>, vector<32x64xf32>
    %cst = arith.constant dense<0.000000e+00> : vector<32x64xf32>
    %2 = tpu.matmul %0, %1, %cst {dimension_numbers = #tpu.dot_dimension_numbers<[1], [0], [0], [1], [0, 0, 1, 1], [], []>} : vector<32x32xf32>, vector<32x64xf32>, vector<32x64xf32> -> vector<32x64xf32>
    %c0_3 = arith.constant 0 : index
    %c0_4 = arith.constant 0 : index
    %3 = vector.load %arg3[%c0_3, %c0_4] : memref<1x64xf32, #tpu.memory_space<vmem>>, vector<1x64xf32>
    %4 = vector.broadcast %3 : vector<1x64xf32> to vector<32x64xf32>
    %5 = arith.addf %2, %4 : vector<32x64xf32>
    %c0_5 = arith.constant 0 : index
    %c0_6 = arith.constant 0 : index
    %6 = vector.load %arg4[%c0_5, %c0_6] : memref<64x32xf32, #tpu.memory_space<vmem>>, vector<64x32xf32>
    %cst_7 = arith.constant dense<0.000000e+00> : vector<32x32xf32>
    %7 = tpu.matmul %5, %6, %cst_7 {dimension_numbers = #tpu.dot_dimension_numbers<[1], [0], [0], [1], [0, 0, 1, 1], [], []>} : vector<32x64xf32>, vector<64x32xf32>, vector<32x32xf32> -> vector<32x32xf32>
    %c0_8 = arith.constant 0 : index
    %c0_9 = arith.constant 0 : index
    %8 = vector.load %arg5[%c0_8, %c0_9] : memref<1x32xf32, #tpu.memory_space<vmem>>, vector<1x32xf32>
    %9 = vector.broadcast %8 : vector<1x32xf32> to vector<32x32xf32>
    %10 = arith.addf %7, %9 : vector<32x32xf32>
    %c0_10 = arith.constant 0 : index
    %c0_11 = arith.constant 0 : index
    %11 = vector.load %arg6[%c0_10, %c0_11] : memref<32x32xf32, #tpu.memory_space<vmem>>, vector<32x32xf32>
    tpu.vector_store %arg6[%c0_10, %c0_11], %10 {strides = array<i32>} : memref<32x32xf32, #tpu.memory_space<vmem>>, vector<32x32xf32>,
    return
  }
  func.func @transform_0(%arg0: i32) -> (i32, i32) {
    %c0_i32 = arith.constant 0 : i32
    %c0_i32_0 = arith.constant 0 : i32
    return %arg0, %c0_i32 : i32, i32
  }
  func.func @transform_1(%arg0: i32) -> (i32, i32) {
    %c0_i32 = arith.constant 0 : i32
    %c0_i32_0 = arith.constant 0 : i32
    %c0_i32_1 = arith.constant 0 : i32
    return %c0_i32, %c0_i32_0 : i32, i32
  }
  func.func @transform_2(%arg0: i32) -> (i32, i32) {
    %c0_i32 = arith.constant 0 : i32
    %c0_i32_0 = arith.constant 0 : i32
    %c0_i32_1 = arith.constant 0 : i32
    return %c0_i32, %c0_i32_0 : i32, i32
  }
  func.func @transform_3(%arg0: i32) -> (i32, i32) {
    %c0_i32 = arith.constant 0 : i32
    %c0_i32_0 = arith.constant 0 : i32
    %c0_i32_1 = arith.constant 0 : i32
    return %c0_i32, %c0_i32_0 : i32, i32
  }
  func.func @transform_4(%arg0: i32) -> (i32, i32) {
    %c0_i32 = arith.constant 0 : i32
    %c0_i32_0 = arith.constant 0 : i32
    %c0_i32_1 = arith.constant 0 : i32
    return %c0_i32, %c0_i32_0 : i32, i32
  }
  func.func @transform_5(%arg0: i32) -> (i32, i32) {
    %c0_i32 = arith.constant 0 : i32
    %c0_i32_0 = arith.constant 0 : i32
    return %arg0, %c0_i32 : i32, i32
  }
}

</mosaic_0001>

<bundles_post_ra>
// kernel: tpu_custom_call.1
= control target key start
LH: loop header
LB: loop body
LE: loop exit
PB: predicated region body
PF: predicated region fallthrough
CT: control target
= control target key end

     0   :  { %vm36_vm0 = vcmask 261120   ;;  %s456_s0 = inlined_call_operand.vmem [shape: f32[32,32], index: 0, kind: input, shape index: {}]   ;;  %s457_s1 = inlined_call_operand.vmem [shape: f32[32,64], index: 1, kind: input, shape index: {}]   ;;  %s458_s2 = inlined_call_operand.vmem [shape: f32[1,64], index: 2, kind: input, shape index: {}]   ;;  %s459_s3 = inlined_call_operand.vmem [shape: f32[64,32], index: 3, kind: input, shape index: {}]   ;;  %s460_s4 = inlined_call_operand.vmem [shape: f32[1,32], index: 4, kind: input, shape index: {}]   ;;  %s461_s5 = inlined_call_operand.hbm [shape: f32[32,32], index: 5, kind: output, shape index: {}]  }
   0x1   :  { %v28_v0 = vld [vmem:[%s457_s1 + $0x18] sm:$0xff]  ;;  %v27_v1 = vld [vmem:[%s457_s1 + $0x10] sm:$0xff]  ;;  %v21_v2 = vld [vmem:[%s456_s0] sm:$0xff] }
   0x2   :  { %297 = vmatprep.subr.mxu0 %v28_v0  ;;  %v26_v3 = vld [vmem:[%s457_s1 + $0x8] sm:$0xff]  ;;  %305 = vmatprep.mubr.msk.f32.mxu0 %vm36_vm0, %v21_v2  ;;  %v141_v4 = vld [vmem:[%s459_s3 + $0x38] sm:$0xff]  ;;  %v140_v5 = vld [vmem:[%s459_s3 + $0x30] sm:$0xff] }
   0x3   :  { %298 = vmatpush3.msra.mxu0 %v28_v0  ;;  %311 = vmatprep.subr.mxu1 %v141_v4  ;;  %v25_v6 = vld [vmem:[%s457_s1] sm:$0xff]  ;;  %v139_v7 = vld [vmem:[%s459_s3 + $0x28] sm:$0xff] }
   0x4   :  { %299 = vmatprep.subr.mxu0 %v27_v1  ;;  %312 = vmatpush3.msra.mxu1 %v141_v4 }
   0x5   :  { %300 = vmatpush3.msra.mxu0 %v27_v1 }
   0x6   :  { %10 = vsyncpa [#allocation3], 0  ;;  %301 = vmatprep.subr.mxu0 %v26_v3  ;;  %313 = vmatprep.subr.mxu1 %v140_v5  ;;  %v22_v8 = vld [vmem:[%s456_s0 + $0x8] sm:$0xff]  ;;  %v138_v9 = vld [vmem:[%s459_s3 + $0x20] sm:$0xff]  ;;  %vm149_vm1 = vcmask 523264  }
   0x7   :  { %302 = vmatpush3.msra.mxu0 %v26_v3  ;;  %314 = vmatpush3.msra.mxu1 %v140_v5  ;;  %v23_v10 = vld [vmem:[%s456_s0 + $0x10] sm:$0xff]  ;;  %v137_v11 = vld [vmem:[%s459_s3 + $0x18] sm:$0xff]  ;;  %v135_v14 = vld [vmem:[%s459_s3 + $0x8] sm:$0xff] }
   0x8   :  { %303 = vmatprep.subr.mxu0 %v25_v6  ;;  %315 = vmatprep.subr.mxu1 %v139_v7  ;;  %v24_v12 = vld [vmem:[%s456_s0 + $0x18] sm:$0xff]  ;;  %v136_v13 = vld [vmem:[%s459_s3 + $0x10] sm:$0xff]  ;;  %v134_v15 = vld [vmem:[%s459_s3] sm:$0xff] }
   0x9   :  { %304 = vmatpush3.msra.mxu0 %v25_v6  ;;  %316 = vmatpush3.msra.mxu1 %v139_v7  ;;  %v267_v17 = vld [vmem:[%s458_s2] ss:$0 sm:$0xff]  ;;  %s358_s2 = smov [#allocation2]  }
   0xa   :  { %306 = vmatmul.mubr.msk.f32.vlgmr.msra.gmra.mxu0 %vm36_vm0, %v22_v8  ;;  %317 = vmatprep.subr.mxu1 %v138_v9  ;;  %v272_v25 = vld [vmem:[%s460_s4] ss:$0 sm:$0xff]  ;;  %s256_s26 = sshll.u32 %s358_s2, 4  ;;  %s257_s26 = int_to_ptr.vmem [resolvable:$true] %s256_s26 }
   0xb   :  { %308 = vmatprep.mubr.msk.f32.mxu0 %vm36_vm0, %v23_v10  ;;  %318 = vmatpush3.msra.mxu1 %v138_v9  ;;  %s336_s4 = scalar_lea.vmem %s257_s26, 512  ;;  %p341_p1 = scmp.lt.s32.totalorder %s257_s26, %s257_s26 }
   0xc   :  { %319 = vmatprep.subr.mxu1 %v137_v11  ;;  %p337_p0 = scmp.ne.s32.totalorder %s257_s26, %s336_s4  ;;  %p342_p2 = scmp.lt.s32.totalorder %s336_s4, %s336_s4 }
   0xd   :  { %320 = vmatpush3.msra.mxu1 %v137_v11 }
   0xe   :  { %309 = vmatmul.mubr.msk.f32.gmra.mxu0 %vm36_vm0, %v24_v12  ;;  %321 = vmatprep.subr.mxu1 %v136_v13  ;;  %p343_p3 = por %p342_p2, %p341_p1 }
   0xf   :  { %322 = vmatpush3.msra.mxu1 %v136_v13 }
  0x10   :  { %323 = vmatprep.subr.mxu1 %v135_v14  ;;  %p344_p4 = pnand %p343_p3, %p337_p0 }
  0x11   :  { %324 = vmatpush3.msra.mxu1 %v135_v14 }
  0x12   :  { %325 = vmatprep.subr.mxu1 %v134_v15 }
  0x13   :  { %326 = vmatpush3.msra.mxu1 %v134_v15 }
  0xca   :  { %v307_v16 = vpop.f32.mrf.mxu0 }
  0xcb   :  { %v121_v20 = vadd.f32 %v307_v16, %v267_v17 }
  0xcc   :  { %v115_v18 = vpop.f32.mrf.mxu0 }
  0xcd   :  { %v116_v19 = vadd.f32 %v267_v17, %v115_v18 }
  0xce   :  { %v310_v21 = vpop.f32.mrf.mxu0 }
  0xcf   :  { %327 = vmatprep.mubr.msk.f32.mxu1 %vm149_vm1, %v116_v19  ;;  %v131_v24 = vadd.f32 %v310_v21, %v267_v17 }
  0xd0   :  { %v125_v22 = vpop.f32.mrf.mxu0  ;;  %328 = vmatmul.mubr.msk.f32.vlgmr.msra.gmra.mxu1 %vm149_vm1, %v121_v20 }
  0xd1   :  { %v126_v23 = vadd.f32 %v267_v17, %v125_v22 }
  0xd3   :  { %330 = vmatprep.mubr.msk.f32.mxu1 %vm149_vm1, %v126_v23 }
  0xd4   :  { %331 = vmatmul.mubr.msk.f32.gmra.mxu1 %vm149_vm1, %v131_v24 }
 0x190   :  { %v329_v26 = vpop.f32.mrf.mxu1 }
 0x191   :  { %v234_v27 = vadd.f32 %v329_v26, %v272_v25 }
 0x192   :  { %v228_v28 = vpop.f32.mrf.mxu1 }
 0x193   :  { %248 = vst.msk [vmem:[#allocation2 + $0x8] sm:$0xff] %vm36_vm0, %v234_v27  ;;  %v229_v29 = vadd.f32 %v272_v25, %v228_v28 }
 0x194   :  { %v332_v30 = vpop.f32.mrf.mxu1 }
 0x195   :  { %247 = vst.msk [vmem:[#allocation2] sm:$0xff] %vm36_vm0, %v229_v29  ;;  %v244_v31 = vadd.f32 %v332_v30, %v272_v25 }
 0x196   :  { %v238_v32 = vpop.f32.mrf.mxu1 }
 0x197   :  { %250 = vst.msk [vmem:[#allocation2 + $0x18] sm:$0xff] %vm36_vm0, %v244_v31  ;;  %v239_v33 = vadd.f32 %v272_v25, %v238_v32 }
 0x199   :  { %249 = vst.msk [vmem:[#allocation2 + $0x10] sm:$0xff] %vm36_vm0, %v239_v33 }
 0x19a   :  { %347 = shalt.err (!%p344_p4)
}
 0x19b   :  { %s359_s27 = smov 128   ;;  %s360_s28 = smov 8  }
 0x19c   :  { %262 = dma.vmem_to_hbm [thread:$0]  %s257_s26, 512, %s461_s5, [#allocation3], %s359_s27, %s359_s27, %s360_s28  }
 0x19d   :  { %356 = dma.done.wait [#allocation3], 512  }
 0x19e   :  { %357 = vsyncadd [#allocation3], 4294966784 }
 0x19f   :  { %266 = vsyncpa [#allocation3], 1 }

</bundles_post_ra>
